<compile_context>
chip_gen: v6e
topology: v6e:2x2x1
jax: 0.10.0
libtpu: 0.0.40
codegen_flags: <defaults>
</compile_context>

<pallas_src>
import functools

import jax
import jax.numpy as jnp
from jax import lax
from jax.experimental import pallas as pl
from jax.experimental.pallas import tpu as pltpu


_MIN_GRID_STEPS = 8   # enough steps to shard across 2 TCs and overlap DMA/compute


def _round_up(a, m):
    return ((a + m - 1) // m) * m


def _sublane_multiple(dtype):
    """Sublane-packing-aware row rounding: 8 for f32, 16 for bf16, 32 for int8."""
    itemsize = jnp.dtype(dtype).itemsize
    return 8 * max(1, 4 // itemsize)


def _vmem_params():
    """Returns (target_tile_bytes, base_vmem_limit, vmem_cap) per TPU generation."""
    try:
        cap = int(pltpu.get_tpu_info().vmem_capacity_bytes)
    except Exception:  # info unavailable -> conservative (v7x-safe) defaults
        cap = 64 * 1024 * 1024
    if cap >= 100 * 1024 * 1024:   # v5e / v6e: 128 MiB physical VMEM
        return 4 * 1024 * 1024, 64 * 1024 * 1024, int(cap * 0.9)
    return 2 * 1024 * 1024, 32 * 1024 * 1024, int(cap * 0.9)   # v7x: 64 MiB


def _pick_row_tile(R, row_bytes, sub, target):
    """Largest row tile (multiple of `sub`, or full R) within ~`target` bytes."""
    if R <= sub:
        return R
    budget = (target // max(1, row_bytes)) // sub * sub
    budget = max(sub, budget)
    return R if budget >= R else budget


def _cap_for_steps(tile, extent, unit, other_steps, min_steps=_MIN_GRID_STEPS):
    """Shrink `tile` (kept a multiple of `unit`) so the grid has >= min_steps."""
    if extent <= unit:
        return tile
    if other_steps * pl.cdiv(extent, tile) >= min_steps:
        return tile
    wanted_tiles = pl.cdiv(min_steps, max(1, other_steps))
    cap = max(unit, (pl.cdiv(extent, wanted_tiles) // unit) * unit)
    return min(tile, cap)


def _inv_pow(t, beta):
    """Computes t ** (-beta) for t >= 1 without pow-then-divide.

    beta == 0.75 (the usual LRN exponent) uses rsqrt/sqrt (EUP slot, cheap);
    other betas fall back to exp(-beta * log(t)).
    """
    if beta == 0.75:
        r = lax.rsqrt(t)           # t^-1/2
        return r * jnp.sqrt(r)     # t^-1/2 * t^-1/4 = t^-3/4
    if beta == 0.5:
        return lax.rsqrt(t)
    if beta == 1.0:
        return 1.0 / t
    return jnp.exp(-beta * jnp.log(t))   # assumes t > 0, i.e. alpha >= 0


# --------------------------------------------------------------------------
# local_size == 1: pure elementwise path (lane-dense flat layout).
# --------------------------------------------------------------------------
def _lrn_pointwise_kernel(x_ref, o_ref, *, alpha, beta):
    xf = x_ref[...].astype(jnp.float32)
    t = xf * xf * alpha + 1.0
    o_ref[...] = (xf * _inv_pow(t, beta)).astype(o_ref.dtype)


def _pointwise_path(x, alpha, beta):
    shape = x.shape
    T = x.size
    L = 512                                  # always lane-dense last dim
    Tp = _round_up(T, L)
    xf = x.reshape(T)
    if Tp != T:
        xf = jnp.pad(xf, (0, Tp - T))
    R = Tp // L
    xr = xf.reshape(R, L)

    itemsize = jnp.dtype(x.dtype).itemsize
    sub = _sublane_multiple(x.dtype)
    target, base, cap = _vmem_params()
    tile_r = _pick_row_tile(R, L * itemsize, sub, target)
    tile_r = _cap_for_steps(tile_r, R, sub, 1)
    grid = (pl.cdiv(R, tile_r),)
    need = tile_r * L * (4 * itemsize + 2 * 4)

    out = pl.pallas_call(
        functools.partial(_lrn_pointwise_kernel, alpha=alpha, beta=beta),
        out_shape=jax.ShapeDtypeStruct((R, L), x.dtype),
        grid_spec=pltpu.PrefetchScalarGridSpec(
            num_scalar_prefetch=0,
            grid=grid,
            in_specs=[pl.BlockSpec((tile_r, L), lambda i: (i, 0))],
            out_specs=pl.BlockSpec((tile_r, L), lambda i: (i, 0)),
        ),
        compiler_params=pltpu.CompilerParams(
            dimension_semantics=("parallel",),
            vmem_limit_bytes=int(min(cap, max(base, need)))),
    )(xr)
    return out.reshape(Tp)[:T].reshape(shape)


# --------------------------------------------------------------------------
# Cross-channel LRN (AvgPool3d over the channel axis).
# --------------------------------------------------------------------------
def _lrn_across_kernel(x_ref, o_ref, acc_ref, *, k, alpha, beta):
    """Cross-channel LRN on a (1, C, tile_r, L) block; C is a leading dim."""
    pad = (k - 1) // 2
    xf = x_ref[...][0].astype(jnp.float32)        # (C, tile_r, L)
    x2 = xf * xf
    C = x2.shape[0]
    # Channel-window sum accumulated into a VMEM f32 scratch via leading-dim
    # ref slices: no padded halo copy and no k materialized value slices.
    acc_ref[...] = x2
    for d in range(1, min(pad, C - 1) + 1):
        acc_ref[d:C, :, :] = acc_ref[d:C, :, :] + x2[0:C - d]
        acc_ref[0:C - d, :, :] = acc_ref[0:C - d, :, :] + x2[d:C]
    # AvgPool3d, count_include_pad=True -> divisor is always k (folded below).
    t = acc_ref[...] * (alpha / k) + 1.0
    o_ref[...] = (xf * _inv_pow(t, beta)).astype(o_ref.dtype)[None]


def _across_path(x, k, alpha, beta):
    N, C, H, W = x.shape
    S = H * W
    Sp = _round_up(S, 128)                 # lane axis is ALWAYS a 128 multiple
    xr = x.reshape(N, C, S)
    if Sp != S:
        xr = jnp.pad(xr, ((0, 0), (0, 0), (0, Sp - S)))

    itemsize = jnp.dtype(x.dtype).itemsize
    sub = _sublane_multiple(x.dtype)
    target, base, cap = _vmem_params()

    # Pick L coupled to C so the minimal sub-row block still fits the target
    # (prevents the old 8-row-minimum VMEM overshoot); 128 always divides Sp.
    L = 128
    for cand in (512, 384, 256):
        if Sp % cand == 0 and sub * C * cand * itemsize <= target:
            L = cand
            break
    R = Sp // L
    xr = xr.reshape(N, C, R, L)

    tile_r = _pick_row_tile(R, C * L * itemsize, sub, target)
    tile_r = _cap_for_steps(tile_r, R, sub, N)
    grid = (N, pl.cdiv(R, tile_r))

    block_io = C * tile_r * L * itemsize
    block_f32 = C * tile_r * L * 4
    need = 4 * block_io + 4 * block_f32    # 2x in + 2x out buffers, scratch, temps
    # TODO(synk): halo-tile the channel axis for very large C where even the
    # minimal (sub-row, L=128) block exceeds the VMEM budget.

    out = pl.pallas_call(
        functools.partial(_lrn_across_kernel, k=k, alpha=alpha, beta=beta),
        out_shape=jax.ShapeDtypeStruct((N, C, R, L), x.dtype),
        grid_spec=pltpu.PrefetchScalarGridSpec(
            num_scalar_prefetch=0,
            grid=grid,
            in_specs=[pl.BlockSpec((1, C, tile_r, L), lambda n, r: (n, 0, r, 0))],
            out_specs=pl.BlockSpec((1, C, tile_r, L), lambda n, r: (n, 0, r, 0)),
            scratch_shapes=[pltpu.VMEM((C, tile_r, L), jnp.float32)],
        ),
        compiler_params=pltpu.CompilerParams(
            dimension_semantics=("parallel", "parallel"),
            vmem_limit_bytes=int(min(cap, max(base, need)))),
    )(xr)
    out = out.reshape(N, C, Sp)
    if Sp != S:
        out = out[:, :, :S]
    return out.reshape(N, C, H, W)


# --------------------------------------------------------------------------
# Within-channel LRN (AvgPool2d over H, W) — lane-dense (H, W, N*C) layout.
# --------------------------------------------------------------------------
def _lrn_within_t_kernel(x_ref, o_ref, *, k, alpha, beta):
    """Within-channel LRN on an (H, W, tile_bc) block (N*C is the lane axis)."""
    xf = x_ref[...].astype(jnp.float32)
    x2 = xf * xf
    pad = (k - 1) // 2
    H, W = x2.shape[0], x2.shape[1]
    # Separable k x k window sum (2k adds).  Row pass over H: leading dim ->
    # free slab offsets.  Column pass over W: sublane offsets (no lane motion).
    xp = jnp.pad(x2, ((pad, pad), (0, 0), (0, 0)))
    rs = xp[0:H]
    for d in range(1, k):
        rs = rs + xp[d:d + H]
    rp = jnp.pad(rs, ((0, 0), (pad, pad), (0, 0)))
    s = rp[:, 0:W]
    for d in range(1, k):
        s = s + rp[:, d:d + W]
    # AvgPool2d, count_include_pad=True -> divisor is always k*k (folded).
    t = s * (alpha / (k * k)) + 1.0
    o_ref[...] = (xf * _inv_pow(t, beta)).astype(o_ref.dtype)


def _within_lane_dense_path(x, k, alpha, beta):
    N, C, H, W = x.shape
    BC = N * C
    BCp = _round_up(BC, 128)               # lane axis: always a 128 multiple
    xt = jnp.transpose(x.reshape(BC, H, W), (1, 2, 0))   # (H, W, BC)
    if BCp != BC:
        xt = jnp.pad(xt, ((0, 0), (0, 0), (0, BCp - BC)))

    itemsize = jnp.dtype(x.dtype).itemsize
    target, base, cap = _vmem_params()
    plane_bytes = H * W * itemsize
    tile_bc = (target // max(1, plane_bytes)) // 128 * 128
    tile_bc = max(128, min(BCp, tile_bc))
    tile_bc = _cap_for_steps(tile_bc, BCp, 128, 1)
    grid = (pl.cdiv(BCp, tile_bc),)

    block_io = H * W * tile_bc * itemsize
    block_f32 = H * W * tile_bc * 4
    need = 4 * block_io + 4 * block_f32

    out = pl.pallas_call(
        functools.partial(_lrn_within_t_kernel, k=k, alpha=alpha, beta=beta),
        out_shape=jax.ShapeDtypeStruct((H, W, BCp), x.dtype),
        grid_spec=pltpu.PrefetchScalarGridSpec(
            num_scalar_prefetch=0,
            grid=grid,
            in_specs=[pl.BlockSpec((H, W, tile_bc), lambda b: (0, 0, b))],
            out_specs=pl.BlockSpec((H, W, tile_bc), lambda b: (0, 0, b)),
        ),
        compiler_params=pltpu.CompilerParams(
            dimension_semantics=("parallel",),
            vmem_limit_bytes=int(min(cap, max(base, need)))),
    )(xt)
    if BCp != BC:
        out = out[:, :, :BC]
    return jnp.transpose(out, (2, 0, 1)).reshape(N, C, H, W)


# Fallback for large feature maps where an (H, W, 128) block would not fit the
# per-block byte budget; W is then typically >= 112 lanes so lane occupancy is
# acceptable in the legacy (tile_b, H, W) layout.
def _lrn_within_plane_kernel(x_ref, o_ref, *, k, alpha, beta):
    xf = x_ref[...].astype(jnp.float32)    # (tile_b, H, W)
    x2 = xf * xf
    pad = (k - 1) // 2
    H, W = x2.shape[1], x2.shape[2]
    xp = jnp.pad(x2, ((0, 0), (pad, pad), (0, 0)))
    rs = xp[:, 0:H, :]
    for d in range(1, k):
        rs = rs + xp[:, d:d + H, :]
    rp = jnp.pad(rs, ((0, 0), (0, 0), (pad, pad)))
    s = rp[:, :, 0:W]
    for d in range(1, k):
        s = s + rp[:, :, d:d + W]
    t = s * (alpha / (k * k)) + 1.0
    o_ref[...] = (xf * _inv_pow(t, beta)).astype(o_ref.dtype)


def _within_plane_path(x, k, alpha, beta):
    # TODO(synk): add an H-tiled halo variant for planes too large to hold a
    # whole (H, W) plane in VMEM (e.g. 4096x4096 f32).
    N, C, H, W = x.shape
    BC = N * C
    xr = x.reshape(BC, H, W)
    itemsize = jnp.dtype(x.dtype).itemsize
    target, base, cap = _vmem_params()
    plane_bytes = H * W * itemsize
    tile_b = max(1, min(BC, target // max(1, plane_bytes)))
    tile_b = _cap_for_steps(tile_b, BC, 1, 1)
    grid = (pl.cdiv(BC, tile_b),)
    block_io = tile_b * H * W * itemsize
    block_f32 = tile_b * H * W * 4
    need = 4 * block_io + 4 * block_f32

    out = pl.pallas_call(
        functools.partial(_lrn_within_plane_kernel, k=k, alpha=alpha, beta=beta),
        out_shape=jax.ShapeDtypeStruct((BC, H, W), x.dtype),
        grid_spec=pltpu.PrefetchScalarGridSpec(
            num_scalar_prefetch=0,
            grid=grid,
            in_specs=[pl.BlockSpec((tile_b, H, W), lambda b: (b, 0, 0))],
            out_specs=pl.BlockSpec((tile_b, H, W), lambda b: (b, 0, 0)),
        ),
        compiler_params=pltpu.CompilerParams(
            dimension_semantics=("parallel",),
            vmem_limit_bytes=int(min(cap, max(base, need)))),
    )(xr)
    return out.reshape(N, C, H, W)


# --------------------------------------------------------------------------
# Public entry point (mirrors LRN.forward).
# --------------------------------------------------------------------------
def lrn(x, *, local_size=1, alpha=1.0, beta=0.75, across_channels=False):
    """Pallas TPU forward pass of the LRN module (NCHW input, like PyTorch)."""
    assert x.ndim == 4, "expected NCHW input"
    assert local_size % 2 == 1, "only odd local_size supported (shape-preserving)"
    k = int(local_size)
    alpha = float(alpha)
    beta = float(beta)
    if k == 1:
        # A 1-element average pool is the identity in both modes.
        return _pointwise_path(x, alpha, beta)
    if across_channels:
        return _across_path(x, k, alpha, beta)
    N, C, H, W = x.shape
    if H * W <= 8192:
        return _within_lane_dense_path(x, k, alpha, beta)
    return _within_plane_path(x, k, alpha, beta)


def _lrn_ref(x, *, local_size=1, alpha=1.0, beta=0.75, across_channels=False):
    """Pure-JAX reference mirroring the PyTorch module semantics."""
    k = local_size
    pad = (k - 1) // 2
    xf = x.astype(jnp.float32)
    x2 = xf ** 2
    if across_channels:
        C = x.shape[1]
        x2p = jnp.pad(x2, ((0, 0), (pad, pad), (0, 0), (0, 0)))
        s = sum(x2p[:, d:d + C] for d in range(k))
        div = s / float(k)
    else:
        H, W = x.shape[2], x.shape[3]
        x2p = jnp.pad(x2, ((0, 0), (0, 0), (pad, pad), (pad, pad)))
        s = sum(x2p[:, :, di:di + H, dj:dj + W]
                for di in range(k) for dj in range(k))
        div = s / float(k * k)
    div = (div * alpha + 1.0) ** beta
    return (xf / div).astype(x.dtype)


if __name__ == "__main__":
    key = jax.random.PRNGKey(0)
    x = jax.random.normal(key, (2, 4, 16, 16), dtype=jnp.float32)

    # 1) Default module config: local_size=1, alpha=1.0, beta=0.75, within-channel.
    out = jax.block_until_ready(lrn(x, local_size=1, alpha=1.0, beta=0.75,
                                    across_channels=False))
    ref = _lrn_ref(x, local_size=1, alpha=1.0, beta=0.75, across_channels=False)
    assert jnp.allclose(out, ref, atol=1e-5, rtol=1e-5)

    # 2) AlexNet-style cross-channel LRN, local_size=3.
    out = jax.block_until_ready(lrn(x, local_size=3, alpha=1e-4, beta=0.75,
                                    across_channels=True))
    ref = _lrn_ref(x, local_size=3, alpha=1e-4, beta=0.75, across_channels=True)
    assert jnp.allclose(out, ref, atol=1e-5, rtol=1e-5)

    # 3) Within-channel spatial pooling path, local_size=3 (generic-beta branch).
    out = jax.block_until_ready(lrn(x, local_size=3, alpha=1e-4, beta=0.6,
                                    across_channels=False))
    ref = _lrn_ref(x, local_size=3, alpha=1e-4, beta=0.6, across_channels=False)
    assert jnp.allclose(out, ref, atol=1e-5, rtol=1e-5)

    # 4) Non-128-divisible spatial size (13x13) exercises the lane-padding paths.
    x2 = jax.random.normal(jax.random.PRNGKey(1), (1, 8, 13, 13), dtype=jnp.float32)
    out = jax.block_until_ready(lrn(x2, local_size=5, alpha=2e-4, beta=0.75,
                                    across_channels=True))
    ref = _lrn_ref(x2, local_size=5, alpha=2e-4, beta=0.75, across_channels=True)
    assert jnp.allclose(out, ref, atol=1e-5, rtol=1e-5)

    out = jax.block_until_ready(lrn(x2, local_size=3, alpha=2e-4, beta=0.75,
                                    across_channels=False))
    ref = _lrn_ref(x2, local_size=3, alpha=2e-4, beta=0.75, across_channels=False)
    assert jnp.allclose(out, ref, atol=1e-5, rtol=1e-5)

    print("KERNEL_OK")
</pallas_src>

<mosaic_0001>
module attributes {stable_mosaic.version = 11 : i64} {
  func.func @_lrn_pointwise_kernel(%arg0: i32, %arg1: memref<4x512xf32, #tpu.memory_space<vmem>>, %arg2: memref<4x512xf32, #tpu.memory_space<vmem>>) attributes {dimension_semantics = [#tpu.dimension_semantics<parallel>], iteration_bounds = array<i64: 1>, scalar_prefetch = 0 : i64, scratch_operands = 0 : i64, tpu.core_type = #tpu.core_type<tc>, window_params = [{transform_indices = @transform_0, window_bounds = array<i64: 4, 512>}, {transform_indices = @transform_1, window_bounds = array<i64: 4, 512>}]} {
    %c0 = arith.constant 0 : index
    %c0_0 = arith.constant 0 : index
    %0 = vector.load %arg1[%c0, %c0_0] : memref<4x512xf32, #tpu.memory_space<vmem>>, vector<4x512xf32>
    %1 = arith.mulf %0, %0 : vector<4x512xf32>
    %cst = arith.constant 1.000000e+00 : f32
    %2 = vector.broadcast %cst : f32 to vector<4x512xf32>
    %3 = arith.mulf %1, %2 : vector<4x512xf32>
    %cst_1 = arith.constant 1.000000e+00 : f32
    %4 = vector.broadcast %cst_1 : f32 to vector<4x512xf32>
    %5 = arith.addf %3, %4 : vector<4x512xf32>
    %6 = math.rsqrt %5 : vector<4x512xf32>
    %7 = math.sqrt %6 : vector<4x512xf32>
    %8 = arith.mulf %6, %7 : vector<4x512xf32>
    %9 = arith.mulf %0, %8 : vector<4x512xf32>
    %c0_2 = arith.constant 0 : index
    %c0_3 = arith.constant 0 : index
    %10 = vector.load %arg2[%c0_2, %c0_3] : memref<4x512xf32, #tpu.memory_space<vmem>>, vector<4x512xf32>
    tpu.vector_store %arg2[%c0_2, %c0_3], %9 {strides = array<i32>} : memref<4x512xf32, #tpu.memory_space<vmem>>, vector<4x512xf32>,
    return
  }
  func.func @transform_0(%arg0: i32) -> (i32, i32) {
    %c0_i32 = arith.constant 0 : i32
    %c0_i32_0 = arith.constant 0 : i32
    return %arg0, %c0_i32 : i32, i32
  }
  func.func @transform_1(%arg0: i32) -> (i32, i32) {
    %c0_i32 = arith.constant 0 : i32
    %c0_i32_0 = arith.constant 0 : i32
    return %arg0, %c0_i32 : i32, i32
  }
}

</mosaic_0001>

<bundles_post_ra>
// kernel: tpu_custom_call.1
= control target key start
LH: loop header
LB: loop body
LE: loop exit
PB: predicated region body
PF: predicated region fallthrough
CT: control target
= control target key end

     0   :  { %6 = vsyncpa [#allocation3], 0  ;;  %s136_s0 = inlined_call_operand.hbm [shape: f32[4,512], index: 0, kind: input, shape index: {}]   ;;  %s137_s1 = inlined_call_operand.hbm [shape: f32[4,512], index: 1, kind: output, shape index: {}]  }
   0x1   :  { %7 = vsyncpa [#allocation4], 0  ;;  %s118_s6 = smov [#allocation2]  }
   0x2   :  { %s14_s7 = sshll.u32 %s118_s6, 4  ;;  %s15_s7 = int_to_ptr.vmem [resolvable:$true] %s14_s7 }
   0x3   :  { %s82_s8 = scalar_lea.vmem %s15_s7, 256  ;;  %p87_p1 = scmp.lt.s32.totalorder %s15_s7, %s15_s7 }
   0x4   :  { %p83_p0 = scmp.ne.s32.totalorder %s15_s7, %s82_s8  ;;  %p88_p2 = scmp.lt.s32.totalorder %s82_s8, %s82_s8 }
   0x6   :  { %p89_p3 = por %p88_p2, %p87_p1 }
   0x8   :  { %p90_p4 = pnand %p89_p3, %p83_p0 }
   0xa   :  { %93 = shalt.err (!%p90_p4)
}
   0xb   :  { %17 = dma.hbm_to_vmem [thread:$0]  %s136_s0, 256, %s15_s7, [#allocation3]  }
   0xc   :  { %114 = dma.done.wait [#allocation3], 256  }
   0xd   :  { %115 = vsyncadd [#allocation3], 4294967040  ;;  %v21_v0 = vld [vmem:[#allocation2] sm:$0xff]  ;;  %v22_v1 = vld [vmem:[#allocation2 + $0x8] sm:$0xff]  ;;  %s119_s0 = smov [#allocation5]  }
   0xe   :  { %v23_v2 = vmul.f32 %v21_v0, %v21_v0  ;;  %v24_v3 = vmul.f32 %v22_v1, %v22_v1  ;;  %s55_s11 = sshll.u32 %s119_s0, 4  ;;  %s56_s11 = int_to_ptr.vmem [resolvable:$true] %s55_s11 }
   0xf   :  { %s94_s12 = scalar_lea.vmem %s56_s11, 256  ;;  %p99_p6 = scmp.lt.s32.totalorder %s56_s11, %s56_s11 }
  0x10   :  { %v25_v4 = vadd.f32 1.0, %v23_v2  ;;  %v26_v5 = vadd.f32 1.0, %v24_v3  ;;  %p95_p5 = scmp.ne.s32.totalorder %s56_s11, %s94_s12  ;;  %p100_p7 = scmp.lt.s32.totalorder %s94_s12, %s94_s12 }
  0x12   :  { %66 = vrsqrt.f32 %v25_v4  ;;  %p101_p8 = por %p100_p7, %p99_p6 }
  0x13   :  { %68 = vrsqrt.f32 %v26_v5 }
  0x14   :  { %p102_p9 = pnand %p101_p8, %p95_p5 }
  0x1f   :  { %v67_v6 = vpop.eup %66 }
  0x20   :  { %v69_v7 = vpop.eup %68  ;;  %70 = vrsqrt.f32 %v67_v6  ;;  %vm31_vm0 = vcmp.eq.f32.partialorder %v67_v6, inf  ;;  %v34_v9 = vand.u32 2147483648, %v67_v6  ;;  %vm33_vm1 = vcmp.eq.f32.partialorder %v67_v6, 0.0 }
  0x21   :  { %72 = vrsqrt.f32 %v69_v7  ;;  %vm38_vm2 = vcmp.eq.f32.partialorder %v69_v7, inf  ;;  %v41_v12 = vand.u32 2147483648, %v69_v7  ;;  %vm40_vm3 = vcmp.eq.f32.partialorder %v69_v7, 0.0 }
  0x2d   :  { %v71_v8 = vpop.eup %70 }
  0x2e   :  { %v73_v10 = vpop.eup %72  ;;  %v30_v11 = vmul.f32 %v71_v8, %v67_v6 }
  0x2f   :  { %v37_v13 = vmul.f32 %v73_v10, %v69_v7 }
  0x30   :  { %v32_v14 = vsel %vm31_vm0, %v67_v6, %v30_v11 }
  0x31   :  { %v35_v15 = vsel %vm33_vm1, %v34_v9, %v32_v14  ;;  %v39_v16 = vsel %vm38_vm2, %v69_v7, %v37_v13 }
  0x32   :  { %v43_v17 = vmul.f32 %v67_v6, %v35_v15  ;;  %v42_v18 = vsel %vm40_vm3, %v41_v12, %v39_v16 }
  0x33   :  { %v44_v19 = vmul.f32 %v69_v7, %v42_v18 }
  0x34   :  { %v45_v20 = vmul.f32 %v43_v17, %v21_v0 }
  0x35   :  { %v46_v21 = vmul.f32 %v44_v19, %v22_v1 }
  0x36   :  { %47 = vst [vmem:[#allocation5] sm:$0xff] %v45_v20 }
  0x37   :  { %48 = vst [vmem:[#allocation5 + $0x8] sm:$0xff] %v46_v21 }
  0x38   :  { %105 = shalt.err (!%p102_p9)
}
  0x39   :  { %58 = dma.vmem_to_hbm [thread:$0]  %s56_s11, 256, %s137_s1, [#allocation4]  }
  0x3a   :  { %116 = dma.done.wait [#allocation4], 256  }
  0x3b   :  { %117 = vsyncadd [#allocation4], 4294967040 }
  0x3c   :  { %62 = vsyncpa [#allocation3], 1 }
  0x3d   :  { %63 = vsyncpa [#allocation4], 1 }

</bundles_post_ra>
